<compile_context>
chip_gen: v7x
topology: tpu7x:2x2x1
jax: 0.10.0
libtpu: 0.0.40
codegen_flags: <defaults>
</compile_context>

<pallas_src>
import jax
import jax.numpy as jnp
from jax.experimental import pallas as pl
from jax.experimental.pallas import tpu as pltpu


def _round_up(x, m):
    return (x + m - 1) // m * m


def qnetwork_kernel(x_ref, w1_ref, b1_ref, w2_ref, b2_ref, w3_ref, b3_ref,
                    o_ref, xpad_ref):
    k = x_ref.shape[1]
    # Zero-fill the lane padding, then drop the raw f32 rows in (masked lane store).
    # This keeps the layer-1 contraction dim an aligned multiple of 128 entirely in
    # VMEM; the scratch is re-initialized every step so it is also correct when the
    # batch axis is sharded across TensorCores.
    xpad_ref[...] = jnp.zeros_like(xpad_ref)
    xpad_ref[:, :k] = x_ref[...]

    # Layer 1: (TB, 128) @ (128, 256) in f32 (tiny K; keeps parity with f32 forward).
    h = jnp.dot(xpad_ref[...], w1_ref[...], preferred_element_type=jnp.float32)
    h = jnp.maximum(h + b1_ref[...], 0.0).astype(jnp.bfloat16)
    # Layer 2: (TB, 256) @ (256, 256) -- bf16 operands, f32 accumulation on the MXU.
    h = jnp.dot(h, w2_ref[...], preferred_element_type=jnp.float32)
    h = jnp.maximum(h + b2_ref[...], 0.0).astype(jnp.bfloat16)
    # Layer 3: (TB, 256) @ (256, V), no activation.
    out = jnp.dot(h, w3_ref[...], preferred_element_type=jnp.float32)
    o_ref[...] = (out + b3_ref[...]).astype(o_ref.dtype)


def _prepare_params(params, k_pad):
    """Zero-pad layer-1 fan-in to k_pad (f32, stays VMEM-resident); cast layer 2/3
    weights to bf16 (MXU-native); keep all biases in f32 (VPU math stays f32)."""
    w1, b1 = params["w1"], params["b1"]
    w2, b2 = params["w2"], params["b2"]
    w3, b3 = params["w3"], params["b3"]
    k, h = w1.shape
    w1p = jnp.zeros((k_pad, h), jnp.float32).at[:k, :].set(w1.astype(jnp.float32))
    return (w1p, b1.astype(jnp.float32),
            w2.astype(jnp.bfloat16), b2.astype(jnp.float32),
            w3.astype(jnp.bfloat16), b3.astype(jnp.float32))


def qnetwork_forward(x, params, *, tb=1024):
    """x: (B, input_dim) f32. params: dict of (in,out) weights and (1,out) biases."""
    B, K = x.shape
    H = params["w2"].shape[0]
    V = params["w3"].shape[1]

    K_pad = _round_up(K, 128)                     # in-kernel (VMEM-only) padding target
    # Batch tile: big enough to amortize ~0.35 us/step overhead; multiple of 8 (f32
    # sublanes); clamp for small batches so a 2-row batch isn't tiled at 1024 rows.
    tb = max(8, min(tb, _round_up(B, 8)))
    n_tiles = pl.cdiv(B, tb)                      # ragged last tile handled by Pallas

    w1, b1, w2, b2, w3, b3 = _prepare_params(params, K_pad)

    # Weights/biases: full-array blocks, constant index_map -> resident in VMEM
    # across all grid steps (no re-fetch of the ~200 KB of parameters).
    full = lambda a: pl.BlockSpec(a.shape, lambda i: (0,) * a.ndim)

    flops = 2 * B * (K * H + H * H + H * V)
    bytes_accessed = (x.size * 4
                      + w1.size * 4 + w2.size * 2 + w3.size * 2
                      + (b1.size + b2.size + b3.size) * 4
                      + B * V * 4)

    out = pl.pallas_call(
        qnetwork_kernel,
        out_shape=jax.ShapeDtypeStruct((B, V), jnp.float32),
        grid=(n_tiles,),
        in_specs=[
            pl.BlockSpec((tb, K), lambda i: (i, 0)),   # x batch-tiled; full (=49) last dim
            full(w1), full(b1), full(w2), full(b2), full(w3), full(b3),
        ],
        out_specs=pl.BlockSpec((tb, V), lambda i: (i, 0)),   # only V*4 B/row hit HBM
        scratch_shapes=[pltpu.VMEM((tb, K_pad), jnp.float32)],
        compiler_params=pltpu.CompilerParams(
            # Batch tiles are independent -> shardable across v7x's two TensorCores.
            dimension_semantics=("parallel",)),
        cost_estimate=pl.CostEstimate(
            flops=flops, transcendentals=0, bytes_accessed=bytes_accessed),
    )(x, w1, b1, w2, b2, w3, b3)

    return out


def init_params(key, V_s, E_s):
    """Deterministic synthetic init matching nn.Linear shapes (stored transposed)."""
    input_dim = 3 * V_s + E_s + 9
    dims = [(input_dim, 256), (256, 256), (256, V_s)]
    params = {}
    keys = jax.random.split(key, 2 * len(dims))
    for i, (fan_in, fan_out) in enumerate(dims):
        bound = 1.0 / jnp.sqrt(fan_in)
        params[f"w{i+1}"] = jax.random.uniform(
            keys[2 * i], (fan_in, fan_out), jnp.float32, -bound, bound)
        params[f"b{i+1}"] = jax.random.uniform(
            keys[2 * i + 1], (1, fan_out), jnp.float32, -bound, bound)
    return params


def qnetwork_reference_f32(x, params):
    """Plain-JAX f32 reference of the PyTorch forward."""
    hp = jax.lax.Precision.HIGHEST
    h = jnp.maximum(jnp.dot(x, params["w1"], precision=hp) + params["b1"], 0.0)
    h = jnp.maximum(jnp.dot(h, params["w2"], precision=hp) + params["b2"], 0.0)
    return jnp.dot(h, params["w3"], precision=hp) + params["b3"]


def qnetwork_reference_mixed(x, params):
    """Reference matching the kernel's numerics: f32 layer 1, bf16-in/f32-acc layers 2-3."""
    bf = jnp.bfloat16
    hp = jax.lax.Precision.HIGHEST
    h = jnp.dot(x, params["w1"], precision=hp,
                preferred_element_type=jnp.float32) + params["b1"]
    h = jnp.maximum(h, 0.0).astype(bf)
    h = jnp.dot(h, params["w2"].astype(bf),
                preferred_element_type=jnp.float32) + params["b2"]
    h = jnp.maximum(h, 0.0).astype(bf)
    return jnp.dot(h, params["w3"].astype(bf),
                   preferred_element_type=jnp.float32) + params["b3"]


if __name__ == "__main__":
    V_s, E_s = 8, 16              # input_dim = 3*8 + 16 + 9 = 49
    B = 2
    input_dim = 3 * V_s + E_s + 9

    key = jax.random.PRNGKey(0)
    k_param, k_inp, k_inp2 = jax.random.split(key, 3)
    params = init_params(k_param, V_s, E_s)
    x = jax.random.normal(k_inp, (B, input_dim), jnp.float32)

    out = qnetwork_forward(x, params)
    out = jax.block_until_ready(out)
    assert out.shape == (B, V_s), out.shape

    # Check vs a reference with matching (f32 layer-1, bf16-in/f32-acc) numerics.
    ref_mixed = qnetwork_reference_mixed(x, params)
    assert jnp.allclose(out, ref_mixed, atol=1e-2, rtol=1e-2), "mismatch vs mixed reference"
    # Loose sanity check vs the pure-f32 PyTorch-equivalent forward.
    ref_f32 = qnetwork_reference_f32(x, params)
    assert jnp.allclose(out, ref_f32, atol=5e-2, rtol=5e-2), "mismatch vs f32 reference"

    # Exercise the multi-tile + ragged-last-tile path (B not a multiple of the tile).
    B2 = 37
    x2 = jax.random.normal(k_inp2, (B2, input_dim), jnp.float32)
    out2 = jax.block_until_ready(qnetwork_forward(x2, params, tb=16))
    assert out2.shape == (B2, V_s), out2.shape
    ref2 = qnetwork_reference_mixed(x2, params)
    assert jnp.allclose(out2, ref2, atol=1e-2, rtol=1e-2), "mismatch on ragged batch"

    print("KERNEL_OK")
</pallas_src>

<mosaic_0001>
module attributes {stable_mosaic.version = 11 : i64} {
  func.func @qnetwork_kernel(%arg0: i32, %arg1: memref<8x49xf32, #tpu.memory_space<vmem>>, %arg2: memref<128x256xf32, #tpu.memory_space<vmem>>, %arg3: memref<1x256xf32, #tpu.memory_space<vmem>>, %arg4: memref<256x256xbf16, #tpu.memory_space<vmem>>, %arg5: memref<1x256xf32, #tpu.memory_space<vmem>>, %arg6: memref<256x8xbf16, #tpu.memory_space<vmem>>, %arg7: memref<1x8xf32, #tpu.memory_space<vmem>>, %arg8: memref<8x8xf32, #tpu.memory_space<vmem>>, %arg9: memref<8x128xf32, #tpu.memory_space<vmem>>) attributes {dimension_semantics = [#tpu.dimension_semantics<parallel>], iteration_bounds = array<i64: 1>, scalar_prefetch = 0 : i64, scratch_operands = 1 : i64, tpu.core_type = #tpu.core_type<tc>, window_params = [{transform_indices = @transform_0, window_bounds = array<i64: 8, 49>}, {pipeline_mode = #tpu.pipeline_mode<synchronous>, transform_indices = @transform_1, window_bounds = array<i64: 128, 256>}, {pipeline_mode = #tpu.pipeline_mode<synchronous>, transform_indices = @transform_2, window_bounds = array<i64: 1, 256>}, {pipeline_mode = #tpu.pipeline_mode<synchronous>, transform_indices = @transform_3, window_bounds = array<i64: 256, 256>}, {pipeline_mode = #tpu.pipeline_mode<synchronous>, transform_indices = @transform_4, window_bounds = array<i64: 1, 256>}, {pipeline_mode = #tpu.pipeline_mode<synchronous>, transform_indices = @transform_5, window_bounds = array<i64: 256, 8>}, {pipeline_mode = #tpu.pipeline_mode<synchronous>, transform_indices = @transform_6, window_bounds = array<i64: 1, 8>}, {transform_indices = @transform_7, window_bounds = array<i64: 8, 8>}]} {
    %cst = arith.constant 0.000000e+00 : f32
    %0 = vector.broadcast %cst : f32 to vector<8x128xf32>
    %c0 = arith.constant 0 : index
    %c0_0 = arith.constant 0 : index
    %1 = vector.load %arg9[%c0, %c0_0] : memref<8x128xf32, #tpu.memory_space<vmem>>, vector<8x128xf32>
    tpu.vector_store %arg9[%c0, %c0_0], %0 {strides = array<i32>} : memref<8x128xf32, #tpu.memory_space<vmem>>, vector<8x128xf32>,
    %c0_1 = arith.constant 0 : index
    %c0_2 = arith.constant 0 : index
    %2 = vector.load %arg1[%c0_1, %c0_2] : memref<8x49xf32, #tpu.memory_space<vmem>>, vector<8x49xf32>
    %c0_3 = arith.constant 0 : index
    %c0_4 = arith.constant 0 : index
    %3 = vector.load %arg9[%c0_3, %c0_4] : memref<8x128xf32, #tpu.memory_space<vmem>>, vector<8x49xf32>
    tpu.vector_store %arg9[%c0_3, %c0_4], %2 {strides = array<i32>} : memref<8x128xf32, #tpu.memory_space<vmem>>, vector<8x49xf32>,
    %c0_5 = arith.constant 0 : index
    %c0_6 = arith.constant 0 : index
    %4 = vector.load %arg9[%c0_5, %c0_6] : memref<8x128xf32, #tpu.memory_space<vmem>>, vector<8x128xf32>
    %c0_7 = arith.constant 0 : index
    %c0_8 = arith.constant 0 : index
    %5 = vector.load %arg2[%c0_7, %c0_8] : memref<128x256xf32, #tpu.memory_space<vmem>>, vector<128x256xf32>
    %cst_9 = arith.constant dense<0.000000e+00> : vector<8x256xf32>
    %6 = tpu.matmul %4, %5, %cst_9 {dimension_numbers = #tpu.dot_dimension_numbers<[1], [0], [0], [1], [0, 0, 1, 1], [], []>} : vector<8x128xf32>, vector<128x256xf32>, vector<8x256xf32> -> vector<8x256xf32>
    %c0_10 = arith.constant 0 : index
    %c0_11 = arith.constant 0 : index
    %7 = vector.load %arg3[%c0_10, %c0_11] : memref<1x256xf32, #tpu.memory_space<vmem>>, vector<1x256xf32>
    %8 = vector.broadcast %7 : vector<1x256xf32> to vector<8x256xf32>
    %9 = arith.addf %6, %8 : vector<8x256xf32>
    %cst_12 = arith.constant 0.000000e+00 : f32
    %10 = vector.broadcast %cst_12 : f32 to vector<8x256xf32>
    %11 = arith.maximumf %9, %10 : vector<8x256xf32>
    %12 = arith.truncf %11 : vector<8x256xf32> to vector<8x256xbf16>
    %c0_13 = arith.constant 0 : index
    %c0_14 = arith.constant 0 : index
    %13 = vector.load %arg4[%c0_13, %c0_14] : memref<256x256xbf16, #tpu.memory_space<vmem>>, vector<256x256xbf16>
    %cst_15 = arith.constant dense<0.000000e+00> : vector<8x256xf32>
    %14 = tpu.matmul %12, %13, %cst_15 {dimension_numbers = #tpu.dot_dimension_numbers<[1], [0], [0], [1], [0, 0, 1, 1], [], []>} : vector<8x256xbf16>, vector<256x256xbf16>, vector<8x256xf32> -> vector<8x256xf32>
    %c0_16 = arith.constant 0 : index
    %c0_17 = arith.constant 0 : index
    %15 = vector.load %arg5[%c0_16, %c0_17] : memref<1x256xf32, #tpu.memory_space<vmem>>, vector<1x256xf32>
    %16 = vector.broadcast %15 : vector<1x256xf32> to vector<8x256xf32>
    %17 = arith.addf %14, %16 : vector<8x256xf32>
    %cst_18 = arith.constant 0.000000e+00 : f32
    %18 = vector.broadcast %cst_18 : f32 to vector<8x256xf32>
    %19 = arith.maximumf %17, %18 : vector<8x256xf32>
    %20 = arith.truncf %19 : vector<8x256xf32> to vector<8x256xbf16>
    %c0_19 = arith.constant 0 : index
    %c0_20 = arith.constant 0 : index
    %21 = vector.load %arg6[%c0_19, %c0_20] : memref<256x8xbf16, #tpu.memory_space<vmem>>, vector<256x8xbf16>
    %cst_21 = arith.constant dense<0.000000e+00> : vector<8x8xf32>
    %22 = tpu.matmul %20, %21, %cst_21 {dimension_numbers = #tpu.dot_dimension_numbers<[1], [0], [0], [1], [0, 0, 1, 1], [], []>} : vector<8x256xbf16>, vector<256x8xbf16>, vector<8x8xf32> -> vector<8x8xf32>
    %c0_22 = arith.constant 0 : index
    %c0_23 = arith.constant 0 : index
    %23 = vector.load %arg7[%c0_22, %c0_23] : memref<1x8xf32, #tpu.memory_space<vmem>>, vector<1x8xf32>
    %24 = vector.broadcast %23 : vector<1x8xf32> to vector<8x8xf32>
    %25 = arith.addf %22, %24 : vector<8x8xf32>
    %c0_24 = arith.constant 0 : index
    %c0_25 = arith.constant 0 : index
    %26 = vector.load %arg8[%c0_24, %c0_25] : memref<8x8xf32, #tpu.memory_space<vmem>>, vector<8x8xf32>
    tpu.vector_store %arg8[%c0_24, %c0_25], %25 {strides = array<i32>} : memref<8x8xf32, #tpu.memory_space<vmem>>, vector<8x8xf32>,
    return
  }
  func.func @transform_0(%arg0: i32) -> (i32, i32) {
    %c0_i32 = arith.constant 0 : i32
    %c0_i32_0 = arith.constant 0 : i32
    return %arg0, %c0_i32 : i32, i32
  }
  func.func @transform_1(%arg0: i32) -> (i32, i32) {
    %c0_i32 = arith.constant 0 : i32
    %c0_i32_0 = arith.constant 0 : i32
    %c0_i32_1 = arith.constant 0 : i32
    return %c0_i32, %c0_i32_0 : i32, i32
  }
  func.func @transform_2(%arg0: i32) -> (i32, i32) {
    %c0_i32 = arith.constant 0 : i32
    %c0_i32_0 = arith.constant 0 : i32
    %c0_i32_1 = arith.constant 0 : i32
    return %c0_i32, %c0_i32_0 : i32, i32
  }
  func.func @transform_3(%arg0: i32) -> (i32, i32) {
    %c0_i32 = arith.constant 0 : i32
    %c0_i32_0 = arith.constant 0 : i32
    %c0_i32_1 = arith.constant 0 : i32
    return %c0_i32, %c0_i32_0 : i32, i32
  }
  func.func @transform_4(%arg0: i32) -> (i32, i32) {
    %c0_i32 = arith.constant 0 : i32
    %c0_i32_0 = arith.constant 0 : i32
    %c0_i32_1 = arith.constant 0 : i32
    return %c0_i32, %c0_i32_0 : i32, i32
  }
  func.func @transform_5(%arg0: i32) -> (i32, i32) {
    %c0_i32 = arith.constant 0 : i32
    %c0_i32_0 = arith.constant 0 : i32
    %c0_i32_1 = arith.constant 0 : i32
    return %c0_i32, %c0_i32_0 : i32, i32
  }
  func.func @transform_6(%arg0: i32) -> (i32, i32) {
    %c0_i32 = arith.constant 0 : i32
    %c0_i32_0 = arith.constant 0 : i32
    %c0_i32_1 = arith.constant 0 : i32
    return %c0_i32, %c0_i32_0 : i32, i32
  }
  func.func @transform_7(%arg0: i32) -> (i32, i32) {
    %c0_i32 = arith.constant 0 : i32
    %c0_i32_0 = arith.constant 0 : i32
    return %arg0, %c0_i32 : i32, i32
  }
}

</mosaic_0001>

<bundles_post_ra>
// kernel: tpu_custom_call.1
= control target key start
LH: loop header
LB: loop body
LE: loop exit
PB: predicated region body
PF: predicated region fallthrough
CT: control target
= control target key end

     0   :  { %12 = vsyncpa [#allocation4], 0  ;;  %s1019_s0 = inlined_call_operand.vmem [shape: f32[2,49], index: 0, kind: input, shape index: {}]   ;;  %s1020_s1 = inlined_call_operand.hbm [shape: f32[128,256], index: 1, kind: input, shape index: {}]   ;;  %s1021_s2 = inlined_call_operand.vmem [shape: f32[1,256], index: 2, kind: input, shape index: {}]   ;;  %s1022_s3 = inlined_call_operand.hbm [shape: bf16[256,256], index: 3, kind: input, shape index: {}]   ;;  %s1023_s4 = inlined_call_operand.vmem [shape: f32[1,256], index: 4, kind: input, shape index: {}]   ;;  %s1024_s5 = inlined_call_operand.vmem [shape: bf16[256,8], index: 5, kind: input, shape index: {}]   ;;  %s1025_s6 = inlined_call_operand.vmem [shape: f32[1,8], index: 6, kind: input, shape index: {}]   ;;  %s1026_s7 = inlined_call_operand.hbm [shape: f32[2,8], index: 7, kind: output, shape index: {}]  }
   0x1   :  { %13 = vsyncpa [#allocation7], 0 }
   0x2   :  { %14 = vsyncpa [#allocation5], 0  ;;  %s873_s24 = smov [#allocation3]   ;;  %s801_s28 = scalar_lea.hbm %s1020_s1, 4096 }
   0x3   :  { %s22_s25 = sshll.u32 %s873_s24, 4  ;;  %p802_p0 = scmp.ne.s32.totalorder %s1020_s1, %s801_s28  ;;  %s23_s25 = int_to_ptr.vmem [resolvable:$true] %s22_s25 }
   0x4   :  { %p805_p1 = scmp.lt.u32.totalorder %s801_s28, %s1020_s1 }
   0x6   :  { %p807_p2 = pnand %p805_p1, %p802_p0 }
   0x8   :  { %810 = shalt.err (!%p807_p2)
}
   0x9   :  { %s811_s10 = scalar_lea.vmem %s23_s25, 4096  ;;  %p816_p4 = scmp.lt.s32.totalorder %s23_s25, %s23_s25 }
   0xa   :  { %p812_p3 = scmp.ne.s32.totalorder %s23_s25, %s811_s10  ;;  %p817_p5 = scmp.lt.s32.totalorder %s811_s10, %s811_s10 }
   0xc   :  { %p818_p6 = por %p817_p5, %p816_p4 }
   0xe   :  { %p819_p7 = pnand %p818_p6, %p812_p3 }
  0x10   :  { %822 = shalt.err (!%p819_p7)
}
  0x11   :  { %s874_s11 = smov 256   ;;  %s875_s12 = smov 16  }
  0x12   :  { %28 = dma.hbm_to_vmem [thread:$0]  %s1020_s1, 4096, %s23_s25, [#allocation4], %s874_s11, %s874_s11, %s875_s12  }
  0x13   :  { %s876_s15 = smov [#allocation6]   ;;  %s823_s19 = scalar_lea.hbm %s1022_s3, 4096 }
  0x14   :  { %s36_s16 = sshll.u32 %s876_s15, 4  ;;  %p824_p8 = scmp.ne.s32.totalorder %s1022_s3, %s823_s19  ;;  %s37_s16 = int_to_ptr.vmem [resolvable:$true] %s36_s16 }
  0x15   :  { %p827_p9 = scmp.lt.u32.totalorder %s823_s19, %s1022_s3 }
  0x17   :  { %p829_p10 = pnand %p827_p9, %p824_p8 }
  0x19   :  { %832 = shalt.err (!%p829_p10)
}
  0x1a   :  { %s833_s24 = scalar_lea.vmem %s37_s16, 4096  ;;  %p838_p12 = scmp.lt.s32.totalorder %s37_s16, %s37_s16 }
  0x1b   :  { %p834_p11 = scmp.ne.s32.totalorder %s37_s16, %s833_s24  ;;  %p839_p13 = scmp.lt.s32.totalorder %s833_s24, %s833_s24 }
  0x1d   :  { %p840_p0 = por %p839_p13, %p838_p12 }
  0x1f   :  { %p841_p1 = pnand %p840_p0, %p834_p11 }
  0x21   :  { %844 = shalt.err (!%p841_p1)
}
  0x22   :  { %s877_s1 = smov 128   ;;  %s878_s25 = smov 8  }
  0x23   :  { %42 = dma.hbm_to_vmem [thread:$0]  %s1022_s3, 4096, %s37_s16, [#allocation7], %s877_s1, %s877_s1, %s878_s25  }
  0x24   :  { %867 = dma.done.wait [#allocation4], 4096  }
  0x25   :  { %868 = vsyncadd [#allocation4], 4294963200 }
  0x26   :  { %869 = dma.done.wait [#allocation7], 4096  }
  0x27   :  { %870 = vsyncadd [#allocation7], 4294963200  ;;  %v879_v0 = vmov 0.0   ;;  %v62_v1 = vld [vmem:[#allocation3 + $0x8] sm:$0xff]  ;;  %v64_v2 = vld [vmem:[#allocation3 + $0x18] sm:$0xff]  ;;  %vm58_vm0 = vcmask 400384  }
  0x28   :  { %56 = vst [vmem:[#allocation2] sm:$0xff] %v879_v0  ;;  %169 = vmatprep.mubr.f32.mxu0 %v879_v0  ;;  %v61_v3 = vld [vmem:[#allocation3] sm:$0xff]  ;;  %v695_v4 = vpack.c.bf16 %v64_v2, %v62_v1  ;;  %v63_v5 = vld [vmem:[#allocation3 + $0x10] sm:$0xff]  ;;  %v66_v6 = vld [vmem:[#allocation3 + $0x28] sm:$0xff]  ;;  %vm604_vm1 = vcmask 64512  }
  0x29   :  { %v68_v7 = vld [vmem:[#allocation3 + $0x38] sm:$0xff]  ;;  %v697_v8 = vpack.c.bf16 %v63_v5, %v61_v3  ;;  %v65_v10 = vld [vmem:[#allocation3 + $0x20] sm:$0xff]  ;;  %v67_v11 = vld [vmem:[#allocation3 + $0x30] sm:$0xff] }
  0x2a   :  { %v699_v9 = vpack.c.bf16 %v68_v7, %v66_v6  ;;  %v70_v12 = vld [vmem:[#allocation3 + $0x48] sm:$0xff]  ;;  %696 = vmatprep.subr.bf16.mxu0 %v695_v4  ;;  %v72_v13 = vld [vmem:[#allocation3 + $0x58] sm:$0xff]  ;;  %v701_v14 = vpack.c.bf16 %v67_v11, %v65_v10  ;;  %v69_v16 = vld [vmem:[#allocation3 + $0x40] sm:$0xff] }
  0x2b   :  { %698 = vmatpush1.bf16.msra.mxu0 %v697_v8  ;;  %v703_v15 = vpack.c.bf16 %v72_v13, %v70_v12  ;;  %v71_v17 = vld [vmem:[#allocation3 + $0x50] sm:$0xff]  ;;  %v74_v18 = vld [vmem:[#allocation3 + $0x68] sm:$0xff]  ;;  %v76_v19 = vld [vmem:[#allocation3 + $0x78] sm:$0xff] }
  0x2c   :  { %700 = vmatprep.subr.bf16.mxu0 %v699_v9  ;;  %v705_v20 = vpack.c.bf16 %v71_v17, %v69_v16  ;;  %v707_v21 = vpack.c.bf16 %v76_v19, %v74_v18  ;;  %v73_v22 = vld [vmem:[#allocation3 + $0x60] sm:$0xff]  ;;  %v75_v23 = vld [vmem:[#allocation3 + $0x70] sm:$0xff]  ;;  %v78_v24 = vld [vmem:[#allocation3 + $0x88] sm:$0xff] }
  0x2d   :  { %v80_v25 = vld [vmem:[#allocation3 + $0x98] sm:$0xff]  ;;  %v77_v27 = vld [vmem:[#allocation3 + $0x80] sm:$0xff]  ;;  %v79_v28 = vld [vmem:[#allocation3 + $0x90] sm:$0xff]  ;;  %v709_v30 = vpack.c.bf16 %v75_v23, %v73_v22 }
  0x2e   :  { %v57_v26 = vld [vmem:[%s1019_s0] sm:$0xff]  ;;  %v737_v29 = vld [vmem:[#allocation6 + $0x4] ss:$8 sps:$4 sm:$0xff]   ;;  %v739_v31 = vld [vmem:[#allocation6] ss:$8 sps:$4 sm:$0xff]   ;;  %v711_v32 = vpack.c.bf16 %v80_v25, %v78_v24  ;;  %v713_v38 = vpack.c.bf16 %v79_v28, %v77_v27 }
  0x2f   :  { %702 = vmatpush1.bf16.msra.mxu0 %v701_v14  ;;  %59 = vst.msk [vmem:[#allocation2] sm:$0xff] %vm58_vm0, %v57_v26  ;;  %v82_v33 = vld [vmem:[#allocation3 + $0xa8] sm:$0xff]  ;;  %384 = vmatprep.subr.bf16.mxu1 %v737_v29  ;;  %v740_v34 = vld [vmem:[#allocation6 + $0x14] ss:$8 sps:$4 sm:$0xff]   ;;  %v742_v36 = vld [vmem:[#allocation6 + $0x10] ss:$8 sps:$4 sm:$0xff]  }
  0x30   :  { %704 = vmatprep.subr.bf16.mxu0 %v703_v15  ;;  %v84_v35 = vld [vmem:[#allocation3 + $0xb8] sm:$0xff]  ;;  %385 = vmatpush1.bf16.msra.mxu1 %v739_v31  ;;  %v743_v37 = vld [vmem:[#allocation6 + $0x24] ss:$8 sps:$4 sm:$0xff]   ;;  %v83_v41 = vld [vmem:[#allocation3 + $0xb0] sm:$0xff]  ;;  %v95_v31 = vlaneseq }
  0x31   :  { %386 = vmatprep.subr.bf16.mxu1 %v740_v34  ;;  %v81_v39 = vld [vmem:[#allocation3 + $0xa0] sm:$0xff]  ;;  %v715_v40 = vpack.c.bf16 %v84_v35, %v82_v33  ;;  %v86_v42 = vld [vmem:[#allocation3 + $0xc8] sm:$0xff]  ;;  %v88_v43 = vld [vmem:[#allocation3 + $0xd8] sm:$0xff] }
  0x32   :  { %v745_v44 = vld [vmem:[#allocation6 + $0x20] ss:$8 sps:$4 sm:$0xff]   ;;  %v746_v45 = vld [vmem:[#allocation6 + $0x34] ss:$8 sps:$4 sm:$0xff]   ;;  %v717_v46 = vpack.c.bf16 %v83_v41, %v81_v39  ;;  %v719_v49 = vpack.c.bf16 %v88_v43, %v86_v42  ;;  %v748_v52 = vld [vmem:[#allocation6 + $0x30] ss:$8 sps:$4 sm:$0xff]  }
  0x33   :  { %706 = vmatpush1.bf16.msra.mxu0 %v705_v20  ;;  %v85_v47 = vld [vmem:[#allocation3 + $0xc0] sm:$0xff]  ;;  %v87_v48 = vld [vmem:[#allocation3 + $0xd0] sm:$0xff]  ;;  %v90_v50 = vld [vmem:[#allocation3 + $0xe8] sm:$0xff] }
  0x34   :  { %708 = vmatprep.subr.bf16.mxu0 %v707_v21  ;;  %387 = vmatpush1.bf16.msra.mxu1 %v742_v36  ;;  %v92_v51 = vld [vmem:[#allocation3 + $0xf8] sm:$0xff]  ;;  %v749_v53 = vld [vmem:[#allocation6 + $0x44] ss:$8 sps:$4 sm:$0xff]   ;;  %v721_v54 = vpack.c.bf16 %v87_v48, %v85_v47  ;;  %v91_v57 = vld [vmem:[#allocation3 + $0xf0] sm:$0xff] }
  0x35   :  { %388 = vmatprep.subr.bf16.mxu1 %v743_v37  ;;  %v723_v55 = vpack.c.bf16 %v92_v51, %v90_v50  ;;  %v89_v56 = vld [vmem:[#allocation3 + $0xe0] sm:$0xff]  ;;  %v752_v59 = vld [vmem:[#allocation6 + $0x54] ss:$8 sps:$4 sm:$0xff]   ;;  %v754_v61 = vld [vmem:[#allocation6 + $0x50] ss:$8 sps:$4 sm:$0xff]  }
  0x36   :  { %v751_v58 = vld [vmem:[#allocation6 + $0x40] ss:$8 sps:$4 sm:$0xff]   ;;  %v725_v60 = vpack.c.bf16 %v91_v57, %v89_v56  ;;  %v60_v62 = vld [vmem:[#allocation2] sm:$0xff]  ;;  %v755_v63 = vld [vmem:[#allocation6 + $0x64] ss:$8 sps:$4 sm:$0xff]  }
  0x37   :  { %710 = vmatpush1.bf16.msra.mxu0 %v709_v30  ;;  %v757_v0 = vld [vmem:[#allocation6 + $0x60] ss:$8 sps:$4 sm:$0xff]   ;;  %v758_v1 = vld [vmem:[#allocation6 + $0x74] ss:$8 sps:$4 sm:$0xff]   ;;  %v760_v2 = vld [vmem:[#allocation6 + $0x70] ss:$8 sps:$4 sm:$0xff]  }
  0x38   :  { %712 = vmatprep.subr.bf16.mxu0 %v711_v32  ;;  %389 = vmatpush1.bf16.msra.mxu1 %v745_v44  ;;  %v761_v3 = vld [vmem:[#allocation6 + $0x84] ss:$8 sps:$4 sm:$0xff]   ;;  %v763_v4 = vld [vmem:[#allocation6 + $0x80] ss:$8 sps:$4 sm:$0xff]   ;;  %v764_v5 = vld [vmem:[#allocation6 + $0x94] ss:$8 sps:$4 sm:$0xff]  }
  0x39   :  { %390 = vmatprep.subr.bf16.mxu1 %v746_v45  ;;  %v766_v6 = vld [vmem:[#allocation6 + $0x90] ss:$8 sps:$4 sm:$0xff]   ;;  %v767_v7 = vld [vmem:[#allocation6 + $0xa4] ss:$8 sps:$4 sm:$0xff]   ;;  %v769_v8 = vld [vmem:[#allocation6 + $0xa0] ss:$8 sps:$4 sm:$0xff]  }
  0x3a   :  { %v770_v9 = vld [vmem:[#allocation6 + $0xb4] ss:$8 sps:$4 sm:$0xff]   ;;  %v772_v10 = vld [vmem:[#allocation6 + $0xb0] ss:$8 sps:$4 sm:$0xff]   ;;  %v773_v11 = vld [vmem:[#allocation6 + $0xc4] ss:$8 sps:$4 sm:$0xff]  }
  0x3b   :  { %714 = vmatpush1.bf16.msra.mxu0 %v713_v38  ;;  %v775_v12 = vld [vmem:[#allocation6 + $0xc0] ss:$8 sps:$4 sm:$0xff]   ;;  %v776_v13 = vld [vmem:[#allocation6 + $0xd4] ss:$8 sps:$4 sm:$0xff]   ;;  %v778_v14 = vld [vmem:[#allocation6 + $0xd0] ss:$8 sps:$4 sm:$0xff]  }
  0x3c   :  { %716 = vmatprep.subr.bf16.mxu0 %v715_v40  ;;  %391 = vmatpush1.bf16.msra.mxu1 %v748_v52  ;;  %v779_v15 = vld [vmem:[#allocation6 + $0xe4] ss:$8 sps:$4 sm:$0xff]   ;;  %v781_v16 = vld [vmem:[#allocation6 + $0xe0] ss:$8 sps:$4 sm:$0xff]   ;;  %v782_v17 = vld [vmem:[#allocation6 + $0xf4] ss:$8 sps:$4 sm:$0xff]  }
  0x3d   :  { %392 = vmatprep.subr.bf16.mxu1 %v749_v53  ;;  %v784_v18 = vld [vmem:[#allocation6 + $0xf0] ss:$8 sps:$4 sm:$0xff]   ;;  %v787_v21 = vld [vmem:[%s1024_s5 + $0x48] sm:$0xff]   ;;  %v789_v23 = vld [vmem:[%s1024_s5 + $0x50] sm:$0xff]   ;;  %v96_v32 = vshrl.u32 %v95_v31, 7 }
  0x3e   :  { %v785_v19 = vld [vmem:[%s1024_s5 + $0x40] sm:$0xff]   ;;  %v788_v22 = vld [vmem:[%s1024_s5 + $0x8] sm:$0xff]   ;;  %v790_v24 = vld [vmem:[%s1024_s5 + $0x10] sm:$0xff]  }
  0x3f   :  { %718 = vmatpush1.bf16.msra.mxu0 %v717_v46  ;;  %v786_v20 = vld [vmem:[%s1024_s5] sm:$0xff]   ;;  %v791_v25 = vld [vmem:[%s1024_s5 + $0x58] sm:$0xff]   ;;  %v795_v29 = vld [vmem:[%s1024_s5 + $0x68] sm:$0xff]   ;;  %v97_v33 = vsub.s32 0, %v96_v32  ;;  %v101_v35 = vsub.s32 1, %v96_v32 }
  0x40   :  { %720 = vmatprep.subr.bf16.mxu0 %v719_v49  ;;  %393 = vmatpush1.bf16.msra.mxu1 %v751_v58  ;;  %v792_v26 = vld [vmem:[%s1024_s5 + $0x18] sm:$0xff]   ;;  %v793_v27 = vld [vmem:[%s1024_s5 + $0x60] sm:$0xff]   ;;  %v796_v30 = vld [vmem:[%s1024_s5 + $0x28] sm:$0xff]  }
  0x41   :  { %394 = vmatprep.subr.bf16.mxu1 %v752_v59  ;;  %v794_v28 = vld [vmem:[%s1024_s5 + $0x20] sm:$0xff]   ;;  %v797_v46 = vld [vmem:[%s1024_s5 + $0x70] sm:$0xff]   ;;  %v799_v48 = vld [vmem:[%s1024_s5 + $0x78] sm:$0xff]  }
  0x42   :  { %v93_v34 = vld [vmem:[%s1021_s2] sm:$0x3]  ;;  %v798_v47 = vld [vmem:[%s1024_s5 + $0x30] sm:$0xff]   ;;  %v800_v49 = vld [vmem:[%s1024_s5 + $0x38] sm:$0xff]  }
  0x43   :  { %722 = vmatpush1.bf16.msra.mxu0 %v721_v54  ;;  %v98_v36 = vrot.slane %v93_v34, %v97_v33  ;;  %v102_v37 = vrot.slane %v93_v34, %v101_v35  ;;  %v212_v50 = vld [vmem:[%s1023_s4] sm:$0x3] }
  0x44   :  { %724 = vmatprep.subr.bf16.mxu0 %v723_v55  ;;  %395 = vmatpush1.bf16.msra.mxu1 %v754_v61  ;;  %v217_v51 = vrot.slane %v212_v50, %v97_v33  ;;  %v221_v52 = vrot.slane %v212_v50, %v101_v35 }
  0x45   :  { %396 = vmatprep.subr.bf16.mxu1 %v755_v63 }
  0x47   :  { %726 = vmatpush1.bf16.msra.mxu0 %v725_v60 }
  0x48   :  { %397 = vmatpush1.bf16.msra.mxu1 %v757_v0  ;;  %673 = vmatprep.subr.bf16.mxu0 %v785_v19  ;;  %v656_v0 = vld [vmem:[%s1025_s6] ss:$0 sm:$0xff] }
  0x49   :  { %398 = vmatprep.subr.bf16.mxu1 %v758_v1 }
  0x4a   :  { %170 = vmatmul.mubr.f32.vlgmr.msra.gmra.mrb[0].mxu0 %v60_v62 }
  0x4b   :  { %674 = vmatpush3.bf16.msra.mxu0 %v786_v20 }
  0x4c   :  { %399 = vmatpush1.bf16.msra.mxu1 %v760_v2  ;;  %675 = vmatprep.subr.bf16.mxu0 %v787_v21 }
  0x4d   :  { %400 = vmatprep.subr.bf16.mxu1 %v761_v3 }
  0x4f   :  { %676 = vmatpush3.bf16.msra.mxu0 %v788_v22 }
  0x50   :  { %401 = vmatpush1.bf16.msra.mxu1 %v763_v4  ;;  %677 = vmatprep.subr.bf16.mxu0 %v789_v23 }
  0x51   :  { %402 = vmatprep.subr.bf16.mxu1 %v764_v5 }
  0x53   :  { %678 = vmatpush3.bf16.msra.mxu0 %v790_v24 }
  0x54   :  { %403 = vmatpush1.bf16.msra.mxu1 %v766_v6  ;;  %679 = vmatprep.subr.bf16.mxu0 %v791_v25 }
  0x55   :  { %404 = vmatprep.subr.bf16.mxu1 %v767_v7 }
  0x57   :  { %680 = vmatpush3.bf16.msra.mxu0 %v792_v26 }
  0x58   :  { %405 = vmatpush1.bf16.msra.mxu1 %v769_v8  ;;  %681 = vmatprep.subr.bf16.mxu0 %v793_v27 }
  0x59   :  { %406 = vmatprep.subr.bf16.mxu1 %v770_v9 }
  0x5b   :  { %682 = vmatpush3.bf16.msra.mxu0 %v794_v28 }
  0x5c   :  { %407 = vmatpush1.bf16.msra.mxu1 %v772_v10  ;;  %683 = vmatprep.subr.bf16.mxu0 %v795_v29 }
  0x5d   :  { %408 = vmatprep.subr.bf16.mxu1 %v773_v11 }
  0x5f   :  { %684 = vmatpush3.bf16.msra.mxu0 %v796_v30 }
  0x60   :  { %409 = vmatpush1.bf16.msra.mxu1 %v775_v12  ;;  %685 = vmatprep.subr.bf16.mxu0 %v797_v46 }
  0x61   :  { %410 = vmatprep.subr.bf16.mxu1 %v776_v13 }
  0x63   :  { %686 = vmatpush3.bf16.msra.mxu0 %v798_v47 }
  0x64   :  { %411 = vmatpush1.bf16.msra.mxu1 %v778_v14  ;;  %687 = vmatprep.subr.bf16.mxu0 %v799_v48 }
  0x65   :  { %412 = vmatprep.subr.bf16.mxu1 %v779_v15 }
  0x67   :  { %688 = vmatpush3.bf16.msra.mxu0 %v800_v49 }
  0x68   :  { %413 = vmatpush1.bf16.msra.mxu1 %v781_v16 }
  0x69   :  { %414 = vmatprep.subr.bf16.mxu1 %v782_v17 }
  0x6c   :  { %415 = vmatpush1.bf16.msra.mxu1 %v784_v18 }
 0x11d   :  { %v171_v38 = vpop.f32.mrb[0].mxu0 }
 0x11e   :  { %v172_v39 = vadd.f32 %v171_v38, %v98_v36  ;;  %v173_v40 = vpop.f32.mrb[1].mxu0 }
 0x11f   :  { %v174_v41 = vadd.f32 %v173_v40, %v102_v37 }
 0x120   :  { %v176_v42 = vmax.f32 %v172_v39, 0.0 }
 0x121   :  { %v177_v43 = vmax.f32 %v174_v41, 0.0 }
 0x122   :  { %v178_v45 = vpack.c.bf16 %v176_v42, %v176_v42 }
 0x123   :  { %v179_v44 = vpack.c.bf16 %v177_v43, %v177_v43 }
 0x125   :  { %416 = vmatprep.mubr.bf16.mxu1 %v179_v44 }
 0x126   :  { %417 = vmatmul.mubr.bf16.vlgmr.msra.gmra.mrb[0].mxu1 %v178_v45 }
 0x1f9   :  { %v418_v53 = vpop.f32.mrb[0].mxu1 }
 0x1fa   :  { %v419_v54 = vadd.f32 %v418_v53, %v217_v51  ;;  %v420_v55 = vpop.f32.mrb[1].mxu1 }
 0x1fb   :  { %v421_v56 = vadd.f32 %v420_v55, %v221_v52  ;;  %v422_v57 = vpop.f32.mrb[2].mxu1 }
 0x1fc   :  { %v425_v58 = vmax.f32 %v419_v54, 0.0  ;;  %v423_v59 = vpop.f32.mrb[3].mxu1 }
 0x1fd   :  { %v426_v60 = vmax.f32 %v421_v56, 0.0 }
 0x1fe   :  { %v427_v62 = vpack.c.bf16 %v425_v58, %v425_v58 }
 0x1ff   :  { %v428_v61 = vpack.c.bf16 %v426_v60, %v426_v60 }
 0x201   :  { %596 = vmatprep.mubr.bf16.mxu0 %v428_v61 }
 0x202   :  { %597 = vmatmul.mubr.bf16.vlgmr.msra.gmra.mrb[4].mxu0 %v427_v62 }
 0x2d5   :  { %v689_v63 = vpop.f32.mrb[4].mxu0 }
 0x2d6   :  { %v690_v1 = vpop.f32.mrb[5].mxu0 }
 0x2d7   :  { %v691_v2 = vadd.f32 %v690_v1, %v689_v63  ;;  %v692_v3 = vpop.f32.mrb[6].mxu0 }
 0x2d8   :  { %v693_v4 = vpop.f32.mrb[7].mxu0 }
 0x2d9   :  { %v599_v5 = vadd.f32 %v691_v2, %v656_v0 }
 0x2db   :  { %605 = vst.msk [vmem:[#allocation8] sm:$0xff] %vm604_vm1, %v599_v5 }
 0x2dc   :  { %610 = vsyncadd [#allocation5], 96  ;;  %s880_s4 = smov [#allocation8]  }
 0x2dd   :  { %s611_s15 = sshll.u32 %s880_s4, 4  ;;  %s612_s15 = int_to_ptr.vmem [resolvable:$true] %s611_s15 }
 0x2de   :  { %s845_s16 = scalar_lea.vmem %s612_s15, 32  ;;  %s849_s17 = scalar_lea.vmem %s612_s15, 128 }
 0x2df   :  { %p846_p2 = scmp.ne.s32.totalorder %s612_s15, %s845_s16  ;;  %p850_p3 = scmp.lt.s32.totalorder %s612_s15, %s612_s15 }
 0x2e0   :  { %p851_p4 = scmp.lt.s32.totalorder %s849_s17, %s845_s16 }
 0x2e2   :  { %p852_p5 = por %p851_p4, %p850_p3 }
 0x2e4   :  { %p853_p6 = pnand %p852_p5, %p846_p2 }
 0x2e6   :  { %856 = shalt.err (!%p853_p6)
}
 0x2e7   :  { %s857_s19 = scalar_lea.hbm %s1026_s7, 32 }
 0x2e8   :  { %p858_p7 = scmp.ne.s32.totalorder %s1026_s7, %s857_s19  ;;  %p861_p8 = scmp.lt.u32.totalorder %s857_s19, %s1026_s7 }
 0x2ea   :  { %p863_p9 = pnand %p861_p8, %p858_p7 }
 0x2ec   :  { %866 = shalt.err (!%p863_p9)
}
 0x2ed   :  { %s881_s24 = smov 32   ;;  %s882_s1 = smov 2  }
 0x2ee   :  { %617 = dma.vmem_to_hbm [thread:$0]  %s612_s15, 32, %s1026_s7, [#allocation5], %s881_s24, %s881_s24, %s882_s1  }
 0x2ef   :  { %871 = dma.done.wait [#allocation5], 128  }
 0x2f0   :  { %872 = vsyncadd [#allocation5], 4294967168 }
 0x2f1   :  { %621 = vsyncpa [#allocation4], 1 }
 0x2f2   :  { %622 = vsyncpa [#allocation7], 1 }
 0x2f3   :  { %623 = vsyncpa [#allocation5], 1 }

</bundles_post_ra>
